<compile_context>
chip_gen: v6e
topology: v6e:2x2x1
jax: 0.10.0
libtpu: 0.0.40
codegen_flags: <defaults>
</compile_context>

<pallas_src>
import jax
import jax.numpy as jnp
from jax.experimental import pallas as pl
from jax.experimental.pallas import tpu as pltpu


# ----------------------------- Pallas kernel --------------------------------
def _patch_embed_kernel(x_ref, w_ref, b_ref, o_ref):
    # x_ref: [TM, K] bf16 patch rows, w_ref: [K, E] bf16, b_ref: [1, E] f32,
    # o_ref: [TM, E]. bf16 operands feed the MXU at full rate; accumulation
    # and the bias add stay in f32.
    acc = jnp.dot(x_ref[...], w_ref[...], preferred_element_type=jnp.float32)
    o_ref[...] = (acc + b_ref[...]).astype(o_ref.dtype)


# ------------------------------- helpers -------------------------------------
def _round_up(x, m):
    return ((x + m - 1) // m) * m


def _choose_tile_m(M):
    """Pick the M tile: multiple of 16 (bf16 sublane packing), large (up to 512)
    for better HBM-roofline fraction, >= 2 grid steps so the "parallel" axis can
    shard across v7x's two TensorCores, and dividing M when possible so no pad
    copy of the activation is needed. Returns (tm, padded_M)."""
    m16 = _round_up(M, 16)
    cap = 512
    if m16 >= 32:                              # guarantee >= 2 grid steps
        cap = max(16, min(cap, (m16 // 2) // 16 * 16))
    if M % 16 == 0:
        for tm in range(cap, 15, -16):         # largest multiple of 16 dividing M
            if M % tm == 0:
                return tm, M
    tm = min(cap, m16)
    return tm, _round_up(M, tm)


def _build_gemm_call(m_pad, tm, K, E, out_dtype, *, single_buffer_invariants):
    x_spec = pl.BlockSpec((tm, K), lambda i: (i, 0))        # tiled over M
    if single_buffer_invariants:
        # Grid-invariant operands (constant index_map): a single VMEM buffer is
        # enough; avoids the default 2x copy when K*E grows to multi-MB sizes.
        w_spec = pl.BlockSpec((K, E), lambda i: (0, 0),
                              pipeline_mode=pl.Buffered(1))
        b_spec = pl.BlockSpec((1, E), lambda i: (0, 0),
                              pipeline_mode=pl.Buffered(1))
    else:
        w_spec = pl.BlockSpec((K, E), lambda i: (0, 0))
        b_spec = pl.BlockSpec((1, E), lambda i: (0, 0))
    return pl.pallas_call(
        _patch_embed_kernel,
        out_shape=jax.ShapeDtypeStruct((m_pad, E), out_dtype),
        grid_spec=pltpu.PrefetchScalarGridSpec(
            num_scalar_prefetch=0,
            grid=(m_pad // tm,),
            in_specs=[x_spec, w_spec, b_spec],
            out_specs=pl.BlockSpec((tm, E), lambda i: (i, 0)),
        ),
        compiler_params=pltpu.CompilerParams(
            dimension_semantics=("parallel",)),
    )


# ------------------------------- wrapper -------------------------------------
def patch_embedding(im, weight, bias, *, patch_size):
    """im: [B, C, H, W]; weight: [E, C, P, P]; bias: [E] -> [B, num_patches, E]."""
    B, C, H, W = im.shape
    P = patch_size
    if H % P != 0 or W % P != 0:
        raise ValueError("image dimensions must be divisible by the patch size")
    GH, GW = H // P, W // P
    num_patches = GH * GW
    E = weight.shape[0]
    K = C * P * P
    M = B * num_patches

    # im2col: [B, C, H, W] -> [B*num_patches, C*P*P], materialized directly in
    # bf16 so the (re-read) [M, K] activation costs half the HBM bytes.
    # Patch order is row-major over the (GH, GW) grid (matches conv output
    # flatten(2)); within a patch the order is (c, kh, kw) to match the
    # Conv2d weight layout [E, C, P, P].
    patches = (im.reshape(B, C, GH, P, GW, P)
                 .transpose(0, 2, 4, 1, 3, 5)
                 .reshape(M, K)
                 .astype(jnp.bfloat16))
    w = weight.reshape(E, K).T.astype(jnp.bfloat16)   # [K, E]
    b = bias.reshape(1, E).astype(jnp.float32)

    tm, m_pad = _choose_tile_m(M)
    if m_pad != M:   # rare: only when no multiple-of-16 tile divides M
        patches = jnp.pad(patches, ((0, m_pad - M), (0, 0)))

    try:
        out = _build_gemm_call(m_pad, tm, K, E, im.dtype,
                               single_buffer_invariants=True)(patches, w, b)
    except Exception:
        # Fallback for JAX versions where BlockSpec pipeline_mode / pl.Buffered
        # single-buffering is unavailable: default double-buffered invariants.
        out = _build_gemm_call(m_pad, tm, K, E, im.dtype,
                               single_buffer_invariants=False)(patches, w, b)

    return out[:M].reshape(B, num_patches, E)


# ------------------------ pure-JAX reference (for check) ---------------------
def patch_embedding_ref(im, weight, bias, patch_size):
    out = jax.lax.conv_general_dilated(
        im, weight,
        window_strides=(patch_size, patch_size),
        padding="VALID",
        dimension_numbers=("NCHW", "OIHW", "NCHW"),
        precision=jax.lax.Precision.HIGHEST)
    B, E, GH, GW = out.shape
    out = out + bias.reshape(1, E, 1, 1)
    return out.reshape(B, E, GH * GW).transpose(0, 2, 1)


# --------------------------------- main ---------------------------------------
if __name__ == "__main__":
    # Shapes consistent with the module: channels=3, image_size=(128,128),
    # patch_size=16, embed_dim=128 (lane-dense output). M = 2*64 = 128 rows,
    # tm = 64 -> 2 parallel grid steps (both v7x TensorCores busy), no pad.
    B, C = 2, 3
    image_size = (128, 128)
    P = 16
    E = 128

    key = jax.random.PRNGKey(0)
    k_im, k_w, k_b = jax.random.split(key, 3)
    im = jax.random.normal(k_im, (B, C, image_size[0], image_size[1]), jnp.float32)
    weight = jax.random.normal(k_w, (E, C, P, P), jnp.float32) * 0.05
    bias = jax.random.normal(k_b, (E,), jnp.float32) * 0.05

    out = patch_embedding(im, weight, bias, patch_size=P)
    out = jax.block_until_ready(out)

    ref = patch_embedding_ref(im, weight, bias, P)
    num_patches = (image_size[0] // P) * (image_size[1] // P)
    assert out.shape == (B, num_patches, E)
    # bf16 GEMM operands with f32 accumulation over K=768: loosened tolerance
    # vs the f32 reference (per review correctness note).
    assert jnp.allclose(out, ref, atol=5e-2, rtol=5e-2), "mismatch vs reference"

    print("KERNEL_OK")
</pallas_src>

<mosaic_0001>
module attributes {stable_mosaic.version = 11 : i64} {
  func.func @_patch_embed_kernel(%arg0: i32, %arg1: memref<64x768xbf16, #tpu.memory_space<vmem>>, %arg2: memref<768x128xbf16, #tpu.memory_space<vmem>>, %arg3: memref<1x128xf32, #tpu.memory_space<vmem>>, %arg4: memref<64x128xf32, #tpu.memory_space<vmem>>) attributes {dimension_semantics = [#tpu.dimension_semantics<parallel>], iteration_bounds = array<i64: 2>, scalar_prefetch = 0 : i64, scratch_operands = 0 : i64, tpu.core_type = #tpu.core_type<tc>, window_params = [{transform_indices = @transform_0, window_bounds = array<i64: 64, 768>}, {pipeline_mode = #tpu.pipeline_mode<synchronous>, transform_indices = @transform_1, window_bounds = array<i64: 768, 128>}, {pipeline_mode = #tpu.pipeline_mode<synchronous>, transform_indices = @transform_2, window_bounds = array<i64: 1, 128>}, {transform_indices = @transform_3, window_bounds = array<i64: 64, 128>}]} {
    %c0 = arith.constant 0 : index
    %c0_0 = arith.constant 0 : index
    %0 = vector.load %arg1[%c0, %c0_0] : memref<64x768xbf16, #tpu.memory_space<vmem>>, vector<64x768xbf16>
    %c0_1 = arith.constant 0 : index
    %c0_2 = arith.constant 0 : index
    %1 = vector.load %arg2[%c0_1, %c0_2] : memref<768x128xbf16, #tpu.memory_space<vmem>>, vector<768x128xbf16>
    %cst = arith.constant dense<0.000000e+00> : vector<64x128xf32>
    %2 = tpu.matmul %0, %1, %cst {dimension_numbers = #tpu.dot_dimension_numbers<[1], [0], [0], [1], [0, 0, 1, 1], [], []>} : vector<64x768xbf16>, vector<768x128xbf16>, vector<64x128xf32> -> vector<64x128xf32>
    %c0_3 = arith.constant 0 : index
    %c0_4 = arith.constant 0 : index
    %3 = vector.load %arg3[%c0_3, %c0_4] : memref<1x128xf32, #tpu.memory_space<vmem>>, vector<1x128xf32>
    %4 = vector.broadcast %3 : vector<1x128xf32> to vector<64x128xf32>
    %5 = arith.addf %2, %4 : vector<64x128xf32>
    %c0_5 = arith.constant 0 : index
    %c0_6 = arith.constant 0 : index
    %6 = vector.load %arg4[%c0_5, %c0_6] : memref<64x128xf32, #tpu.memory_space<vmem>>, vector<64x128xf32>
    tpu.vector_store %arg4[%c0_5, %c0_6], %5 {strides = array<i32>} : memref<64x128xf32, #tpu.memory_space<vmem>>, vector<64x128xf32>,
    return
  }
  func.func @transform_0(%arg0: i32) -> (i32, i32) {
    %c0_i32 = arith.constant 0 : i32
    %c0_i32_0 = arith.constant 0 : i32
    return %arg0, %c0_i32 : i32, i32
  }
  func.func @transform_1(%arg0: i32) -> (i32, i32) {
    %c0_i32 = arith.constant 0 : i32
    %c0_i32_0 = arith.constant 0 : i32
    %c0_i32_1 = arith.constant 0 : i32
    return %c0_i32, %c0_i32_0 : i32, i32
  }
  func.func @transform_2(%arg0: i32) -> (i32, i32) {
    %c0_i32 = arith.constant 0 : i32
    %c0_i32_0 = arith.constant 0 : i32
    %c0_i32_1 = arith.constant 0 : i32
    return %c0_i32, %c0_i32_0 : i32, i32
  }
  func.func @transform_3(%arg0: i32) -> (i32, i32) {
    %c0_i32 = arith.constant 0 : i32
    %c0_i32_0 = arith.constant 0 : i32
    return %arg0, %c0_i32 : i32, i32
  }
}

module attributes {stable_mosaic.version = 11 : i64} {
  func.func @_patch_embed_kernel(%arg0: i32, %arg1: memref<64x768xbf16, #tpu.memory_space<vmem>>, %arg2: memref<768x128xbf16, #tpu.memory_space<vmem>>, %arg3: memref<1x128xf32, #tpu.memory_space<vmem>>, %arg4: memref<64x128xf32, #tpu.memory_space<vmem>>) attributes {dimension_semantics = [#tpu.dimension_semantics<parallel>], iteration_bounds = array<i64: 2>, scalar_prefetch = 0 : i64, scratch_operands = 0 : i64, tpu.core_type = #tpu.core_type<tc>, window_params = [{transform_indices = @transform_0, window_bounds = array<i64: 64, 768>}, {pipeline_mode = #tpu.pipeline_mode<synchronous>, transform_indices = @transform_1, window_bounds = array<i64: 768, 128>}, {pipeline_mode = #tpu.pipeline_mode<synchronous>, transform_indices = @transform_2, window_bounds = array<i64: 1, 128>}, {transform_indices = @transform_3, window_bounds = array<i64: 64, 128>}]} {
    %c0 = arith.constant 0 : index
    %c0_0 = arith.constant 0 : index
    %0 = vector.load %arg1[%c0, %c0_0] : memref<64x768xbf16, #tpu.memory_space<vmem>>, vector<64x768xbf16>
    %c0_1 = arith.constant 0 : index
    %c0_2 = arith.constant 0 : index
    %1 = vector.load %arg2[%c0_1, %c0_2] : memref<768x128xbf16, #tpu.memory_space<vmem>>, vector<768x128xbf16>
    %cst = arith.constant dense<0.000000e+00> : vector<64x128xf32>
    %2 = tpu.matmul %0, %1, %cst {dimension_numbers = #tpu.dot_dimension_numbers<[1], [0], [0], [1], [0, 0, 1, 1], [], []>} : vector<64x768xbf16>, vector<768x128xbf16>, vector<64x128xf32> -> vector<64x128xf32>
    %c0_3 = arith.constant 0 : index
    %c0_4 = arith.constant 0 : index
    %3 = vector.load %arg3[%c0_3, %c0_4] : memref<1x128xf32, #tpu.memory_space<vmem>>, vector<1x128xf32>
    %4 = vector.broadcast %3 : vector<1x128xf32> to vector<64x128xf32>
    %5 = arith.addf %2, %4 : vector<64x128xf32>
    %c0_5 = arith.constant 0 : index
    %c0_6 = arith.constant 0 : index
    %6 = vector.load %arg4[%c0_5, %c0_6] : memref<64x128xf32, #tpu.memory_space<vmem>>, vector<64x128xf32>
    tpu.vector_store %arg4[%c0_5, %c0_6], %5 {strides = array<i32>} : memref<64x128xf32, #tpu.memory_space<vmem>>, vector<64x128xf32>,
    return
  }
  func.func @transform_0(%arg0: i32) -> (i32, i32) {
    %c0_i32 = arith.constant 0 : i32
    %c0_i32_0 = arith.constant 0 : i32
    return %arg0, %c0_i32 : i32, i32
  }
  func.func @transform_1(%arg0: i32) -> (i32, i32) {
    %c0_i32 = arith.constant 0 : i32
    %c0_i32_0 = arith.constant 0 : i32
    %c0_i32_1 = arith.constant 0 : i32
    return %c0_i32, %c0_i32_0 : i32, i32
  }
  func.func @transform_2(%arg0: i32) -> (i32, i32) {
    %c0_i32 = arith.constant 0 : i32
    %c0_i32_0 = arith.constant 0 : i32
    %c0_i32_1 = arith.constant 0 : i32
    return %c0_i32, %c0_i32_0 : i32, i32
  }
  func.func @transform_3(%arg0: i32) -> (i32, i32) {
    %c0_i32 = arith.constant 0 : i32
    %c0_i32_0 = arith.constant 0 : i32
    return %arg0, %c0_i32 : i32, i32
  }
}

</mosaic_0001>

<bundles_post_ra>
// kernel: tpu_custom_call.1
= control target key start
LH: loop header
LB: loop body
LE: loop exit
PB: predicated region body
PF: predicated region fallthrough
CT: control target
= control target key end

     0   :  { %8 = vsyncpa [#allocation3], 0  ;;  %s1801_s0 = inlined_call_operand.hbm [shape: bf16[128,768], index: 0, kind: input, shape index: {}]   ;;  %s1802_s1 = inlined_call_operand.hbm [shape: bf16[768,128], index: 1, kind: input, shape index: {}]   ;;  %s1803_s2 = inlined_call_operand.vmem [shape: f32[1,128], index: 2, kind: input, shape index: {}]   ;;  %s1804_s3 = inlined_call_operand.hbm [shape: f32[128,128], index: 3, kind: output, shape index: {}]  }
   0x1   :  { %10 = vsyncpa [#allocation3 + $0x1], 0 }
   0x2   :  { %11 = vsyncpa [#allocation6], 0 }
   0x3   :  { %12 = vsyncpa [#allocation4], 0 }
   0x4   :  { %14 = vsyncpa [#allocation4 + $0x1], 0  ;;  %s1571_s12 = smov 0   ;;  %s1573_s13 = smov 0  }
   0x5   :  { %s1575_s14 = smov 0   ;;  %s1577_s15 = smov 0  }
   0x6 LB: > { %s1592_s16 = sadd.s32 4294967295, %s1540_s15   ;;  %s1043_s17 = sadd.s32 4294967294, %s1540_s15   ;;  %s1540_s15 = sphi %s1577_s15, %s1826_s15   ;;  %s1536_s14 = sphi %s1575_s14, %s1825_s14   ;;  %s1532_s13 = sphi %s1573_s13, %s1824_s13   ;;  %s1528_s12 = sphi %s1571_s12, %s1823_s12  }
   0x7   : > { %p40_p0 = scmp.ne.s32.totalorder %s1532_s13, %s1528_s12  ;;  %p1805_p1 = scmp.eq.s32.totalorder %s1592_s16, 0 }
   0x8   : > { %p112_p3 = scmp.eq.s32.totalorder %s1043_s17, 1  ;;  %p1044_p5 = scmp.ge.s32.totalorder %s1540_s15, 1 }
   0x9   : > { %p1601_p4 = por %p1805_p1, %p40_p0  ;;  %p119_p7 = scmp.lt.s32.totalorder %s1540_s15, 3 }
   0xa   : > { %p1606_p6 = por %p112_p3, %p40_p0  ;;  %s1542_s21 = smov [#allocation5]  }
   0xb   : > { %s1809_s18 = scalar_select %p1601_p4, 1, 0 }
   0xc   : > { %s1810_s19 = scalar_select %p1606_p6, 1, 0 }
   0xd   : > { %p1611_p8 = pnand %p1044_p5, %p119_p7  ;;  %s131_s22 = sshll.u32 %s1542_s21, 4  ;;  %s132_s22 = int_to_ptr.vmem [resolvable:$true] %s131_s22 }
   0xe   : > { %s1625_s24 = sadd.s32 1, %s1540_s15   ;;  %s27_s25 = sadd.s32 1, %s1536_s14 }
   0xf   : > { %s1811_s20 = scalar_select %p1611_p8, 1, 0 }
  0x10   : > { %p1279_p9 = pneg %p1611_p8  ;;  %s24_s26 = ssub.s32 %s1540_s15, %s1625_s24 }
  0x11   : > { %s1429_s27 = scalar_lea.vmem %s132_s22, 6144  ;;  %p1437_p5 = scmp.lt.s32.totalorder %s132_s22, %s132_s22 }
  0x12   : > { %p1620_p11 = pnand %p1279_p9, %p1805_p1  ;;  %p1430_p13 = scmp.ne.s32.totalorder %s132_s22, %s1429_s27 }
  0x13   : > { %p1438_p7 = scmp.lt.s32.totalorder %s1429_s27, %s1429_s27 }
  0x14   : > { %p1420_p12 = pneg %p1620_p11 }
  0x15   : > { %p1439_p10 = por %p1438_p7, %p1437_p5 }
  0x16   : > { %p1432_p0 = pnand %p1430_p13, %p1420_p12 }
  0x18   : > { %p1433_p3 = pneg %p1432_p0 }
  0x1a   : > { %p1440_p2 = pnand %p1439_p10, %p1433_p3 }
  0x1c   : > { %1443 = shalt.err (!%p1440_p2)
}
  0x1d   : > { %s1543_s28 = smov 64   ;;  %s1544_s29 = smov 4  }
  0x1e   : > { %1282 = dma.hbm_to_vmem [thread:$0]  (!%p1620_p11), %s1802_s1, 6144, %s132_s22, [#allocation6], %s1543_s28, %s1543_s28, %s1544_s29  }
  0x1f   : > { %p25_p9 = scmp.eq.s32.totalorder %s24_s26, 0  ;;  %p34_p12 = scmp.ne.s32.totalorder %s1536_s14, %s1532_s13 }
  0x20   : > { %p35_p10 = scmp.eq.s32.totalorder %s1540_s15, 0  ;;  %p1292_p2 = scmp.lt.s32.totalorder %s1540_s15, 2 }
  0x21   : > { %s1642_s5 = scalar_select %p25_p9, %s1536_s14, %s27_s25  }
  0x22   : > { %p36_p13 = por %p35_p10, %p34_p12  ;;  %p1813_p0 = scmp.eq.s32.totalorder %s1592_s16, 1 }
  0x23   : > { %s148_s7 = sand.u32 1, %s1536_s14   ;;  %s1269_s8 = smul.u32 3072, %s1540_s15 }
  0x24   : > { %p1646_p3 = por %p1813_p0, %p34_p12  ;;  %s1268_s9 = smul.u32 192, %s148_s7 }
  0x25   : > { %s1655_s17 = scalar_lea.hbm %s1801_s0, %s1269_s8  ;;  %p1657_p11 = pnand %p1292_p2, %p36_p13 }
  0x26   : > { %s1814_s6 = scalar_select %p1646_p3, 1, 0 }
  0x27   : > { %s152_s22 = scalar_lea.vmem [#allocation2], %s1268_s9  ;;  %s1663_s25 = scalar_lea.sflag [#allocation3], %s148_s7 }
  0x28   : > { %s160_s23 = sshll.u32 %s152_s22, 4  ;;  %s1444_s26 = scalar_lea.hbm %s1655_s17, 3072  ;;  %s1661_s23 = int_to_ptr.vmem [resolvable:$true] %s160_s23 }
  0x29   : > { %p1445_p5 = scmp.ne.s32.totalorder %s1655_s17, %s1444_s26  ;;  %p1446_p7 = pneg %p1657_p11 }
  0x2a   : > { %s1449_s29 = scalar_lea.hbm %s1801_s0, 6144  ;;  %p1450_p10 = scmp.lt.s32.totalorder %s1655_s17, %s1801_s0 }
  0x2b   : > { %p1447_p9 = pnand %p1446_p7, %p1445_p5  ;;  %p1451_p2 = scmp.lt.s32.totalorder %s1449_s29, %s1444_s26 }
  0x2d   : > { %p1448_p12 = pneg %p1447_p9  ;;  %p1452_p13 = por %p1451_p2, %p1450_p10 }
  0x2f   : > { %p1453_p0 = pnand %p1452_p13, %p1448_p12 }
  0x31   : > { %1456 = shalt.err (!%p1453_p0)
}
  0x32   : > { %s1457_s7 = scalar_lea.vmem %s1661_s23, 3072  ;;  %s1545_s8 = smov [#allocation2]  }
  0x33   : > { %p1458_p1 = scmp.ne.s32.totalorder %s1661_s23, %s1457_s7  ;;  %s1462_s9 = sshll.u32 %s1545_s8, 4  ;;  %s1463_s9 = int_to_ptr.vmem [resolvable:$false] %s1462_s9 }
  0x34   : > { %s1464_s10 = scalar_lea.vmem %s1463_s9, 6144  ;;  %p1465_p9 = scmp.lt.s32.totalorder %s1661_s23, %s1463_s9 }
  0x35   : > { %p1460_p6 = pnand %p1458_p1, %p1446_p7  ;;  %p1466_p3 = scmp.lt.s32.totalorder %s1464_s10, %s1457_s7 }
  0x37   : > { %p1461_p5 = pneg %p1460_p6  ;;  %p1467_p4 = por %p1466_p3, %p1465_p9 }
  0x39   : > { %p1468_p8 = pnand %p1467_p4, %p1461_p5 }
  0x3b   : > { %1471 = shalt.err (!%p1468_p8)
}
  0x3c   : > { %s1546_s11 = smov 384   ;;  %s1547_s22 = smov 24  }
  0x3d   : > { %1286 = dma.hbm_to_vmem [thread:$0]  (!%p1657_p11), %s1655_s17, 3072, %s1661_s23, %s1663_s25, %s1546_s11, %s1546_s11, %s1547_s22  }
  0x3e   : > { %p1816_p1 = scmp.ne.s32.totalorder %s1811_s20, 0 }
  0x3f   : > { %s1687_s26 = sand.u32 (!%p1816_p1), 1, %s1532_s13   ;;  %p1817_p4 = scmp.ne.s32.totalorder (!%p1816_p1), %s1809_s18, 0 }
  0x40   : > { %172 = sbr.rel (%p1816_p1) target bundleno = 365 (0x16d), region = 32  ;;  %s175_s28 = scalar_lea.sflag (!%p1816_p1), [#allocation3], %s1687_s26 }
  0x41   : > { %s1270_s27 = smul.u32 (!%p1816_p1), 192, %s1687_s26 }
  0x43   : > { %s1691_s29 = scalar_lea.vmem (!%p1816_p1), [#allocation2], %s1270_s27 }
  0x45   : > { %1515 = dma.done.wait (%p1817_p4), %s175_s28, 3072  }
  0x46   : > { %1517 = vsyncadd (%p1817_p4), %s175_s28, 4294964224  ;;  %p1818_p6 = scmp.eq.s32.totalorder %s1592_s16, 0 }
  0x48   : > { %1519 = dma.done.wait (%p1818_p6), [#allocation6], 6144   ;;  %p1819_p8 = pmov %p1818_p6 }
  0x49   : > { %v1334_v0 = vld [vmem:[#allocation5 + $0x78] sm:$0xff]   ;;  %v1338_v4 = vld [vmem:[#allocation5 + $0x70] sm:$0xff]   ;;  %v1342_v8 = vld [vmem:[#allocation5 + $0x68] sm:$0xff]   ;;  %s1052_s17 = sshll.u32 %s1687_s26, 6  ;;  %s1131_s25 = sshll.u32 %s1592_s16, 10 }
  0x4a   : > { %1521 = vsyncadd (%p1819_p8), [#allocation6], 4294961152  ;;  %v1335_v1 = vld [vmem:[#allocation5 + $0xf8] sm:$0xff]   ;;  %1132 = vmatprep.subr.bf16.mxu0 %v1334_v0  ;;  %v1339_v5 = vld [vmem:[#allocation5 + $0xf0] sm:$0xff]   ;;  %s1737_s21 = scalar_lea.vmem [#allocation7], %s1052_s17  ;;  %s1756_s7 = scalar_lea.hbm %s1804_s3, %s1131_s25 }
  0x4b   : > { %v1336_v2 = vld [vmem:[#allocation5 + $0x38] sm:$0xff]   ;;  %1172 = vmatprep.subr.bf16.mxu1 %v1335_v1  ;;  %v1340_v6 = vld [vmem:[#allocation5 + $0x30] sm:$0xff]   ;;  %v1343_v9 = vld [vmem:[#allocation5 + $0xe8] sm:$0xff]   ;;  %s960_s23 = sshll.u32 %s1737_s21, 4  ;;  %s947_s16 = scalar_lea.sflag [#allocation4], %s1687_s26  ;;  %s1750_s23 = int_to_ptr.vmem [resolvable:$true] %s960_s23 }
  0x4c   : > { %v1337_v3 = vld [vmem:[#allocation5 + $0xb8] sm:$0xff]   ;;  %1133 = vmatpush3.bf16.msra.mxu0 %v1336_v2  ;;  %v1341_v7 = vld [vmem:[#allocation5 + $0xb0] sm:$0xff]   ;;  %v1344_v10 = vld [vmem:[#allocation5 + $0x28] sm:$0xff]   ;;  %s1472_s8 = scalar_lea.vmem %s1750_s23, 1024  ;;  %p1820_p11 = scmp.ne.s32.totalorder %s1814_s6, 0 }
  0x4d   : > { %1173 = vmatpush3.bf16.msra.mxu1 %v1337_v3  ;;  %1134 = vmatprep.subr.bf16.mxu0 %v1338_v4  ;;  %v1345_v11 = vld [vmem:[#allocation5 + $0xa8] sm:$0xff]   ;;  %v1346_v12 = vld [vmem:[#allocation5 + $0x60] sm:$0xff]   ;;  %v1350_v16 = vld [vmem:[#allocation5 + $0x58] sm:$0xff]   ;;  %p1473_p3 = scmp.ne.s32.totalorder %s1750_s23, %s1472_s8  ;;  %s1548_s9 = smov [#allocation7]  }
  0x4e   : > { %1174 = vmatprep.subr.bf16.mxu1 %v1339_v5  ;;  %v1347_v13 = vld [vmem:[#allocation5 + $0xe0] sm:$0xff]   ;;  %v1351_v17 = vld [vmem:[#allocation5 + $0xd8] sm:$0xff]   ;;  %v1354_v20 = vld [vmem:[#allocation5 + $0x50] sm:$0xff]   ;;  %s1476_s10 = sshll.u32 %s1548_s9, 4  ;;  %s1477_s10 = int_to_ptr.vmem [resolvable:$false] %s1476_s10 }
  0x4f   : > { %v1348_v14 = vld [vmem:[#allocation5 + $0x20] sm:$0xff]   ;;  %v1352_v18 = vld [vmem:[#allocation5 + $0x18] sm:$0xff]   ;;  %v1355_v21 = vld [vmem:[#allocation5 + $0xd0] sm:$0xff]   ;;  %p1474_p7 = pnand %p1473_p3, %p1820_p11  ;;  %s1478_s11 = scalar_lea.vmem %s1477_s10, 2048 }
  0x50   : > { %1135 = vmatpush3.bf16.msra.mxu0 %v1340_v6  ;;  %v1349_v15 = vld [vmem:[#allocation5 + $0xa0] sm:$0xff]   ;;  %v1353_v19 = vld [vmem:[#allocation5 + $0x98] sm:$0xff]   ;;  %v1356_v22 = vld [vmem:[#allocation5 + $0x10] sm:$0xff]   ;;  %p1479_p10 = scmp.lt.s32.totalorder %s1750_s23, %s1477_s10  ;;  %p1480_p2 = scmp.lt.s32.totalorder %s1478_s11, %s1472_s8 }
  0x51   : > { %1175 = vmatpush3.bf16.msra.mxu1 %v1341_v7  ;;  %1136 = vmatprep.subr.bf16.mxu0 %v1342_v8  ;;  %v1357_v23 = vld [vmem:[#allocation5 + $0x90] sm:$0xff]   ;;  %v1358_v24 = vld [vmem:[#allocation5 + $0x48] sm:$0xff]   ;;  %v1362_v28 = vld [vmem:[#allocation5 + $0x40] sm:$0xff]   ;;  %p1475_p12 = pneg %p1474_p7 }
  0x52   : > { %1176 = vmatprep.subr.bf16.mxu1 %v1343_v9  ;;  %v1359_v25 = vld [vmem:[#allocation5 + $0xc8] sm:$0xff]   ;;  %v1363_v29 = vld [vmem:[#allocation5 + $0xc0] sm:$0xff]   ;;  %v1372_v36 = vld [vmem:[#allocation5 + $0x178] sm:$0xff]   ;;  %p1481_p13 = por %p1480_p2, %p1479_p10 }
  0x53   : > { %v1360_v26 = vld [vmem:[#allocation5 + $0x8] sm:$0xff]   ;;  %v1364_v30 = vld [vmem:[#allocation5] sm:$0xff]   ;;  %v1373_v37 = vld [vmem:[#allocation5 + $0x138] sm:$0xff]  }
  0x54   : > { %1137 = vmatpush3.bf16.msra.mxu0 %v1344_v10  ;;  %v1361_v27 = vld [vmem:[#allocation5 + $0x88] sm:$0xff]   ;;  %v1365_v31 = vld [vmem:[#allocation5 + $0x80] sm:$0xff]   ;;  %v1374_v38 = vld [vmem:[#allocation5 + $0x170] sm:$0xff]   ;;  %p1482_p0 = pnand %p1481_p13, %p1475_p12 }
  0x55   : > { %1177 = vmatpush3.bf16.msra.mxu1 %v1345_v11  ;;  %1138 = vmatprep.subr.bf16.mxu0 %v1346_v12  ;;  %v1366_v32 = vld [vmem:[%s1691_s29] ss:$24 sps:$4 sm:$0xff]   ;;  %v1368_v33 = vld [vmem:[%s1691_s29 + $0x4] ss:$24 sps:$4 sm:$0xff]   ;;  %v1375_v39 = vld [vmem:[#allocation5 + $0x130] sm:$0xff]  }
  0x56   : > { %1178 = vmatprep.subr.bf16.mxu1 %v1347_v13  ;;  %v1369_v34 = vld [vmem:[%s1691_s29 + $0x8] ss:$24 sps:$4 sm:$0xff]   ;;  %v1371_v35 = vld [vmem:[%s1691_s29 + $0xc] ss:$24 sps:$4 sm:$0xff]   ;;  %775 = vmatprep.mubr.bf16.mxu0 %v1368_v33  ;;  %v1378_v41 = vld [vmem:[%s1691_s29 + $0x3c] ss:$24 sps:$4 sm:$0xff]  }
  0x57   : > { %840 = vmatprep.mubr.bf16.mxu1 %v1371_v35  ;;  %v1376_v40 = vld [vmem:[%s1691_s29 + $0x34] ss:$24 sps:$4 sm:$0xff]   ;;  %v1380_v42 = vld [vmem:[%s1691_s29 + $0x30] ss:$24 sps:$4 sm:$0xff]   ;;  %v1384_v46 = vld [vmem:[#allocation5 + $0x160] sm:$0xff]  }
  0x58   : > { %1139 = vmatpush3.bf16.msra.mxu0 %v1348_v14  ;;  %v1381_v43 = vld [vmem:[%s1691_s29 + $0x38] ss:$24 sps:$4 sm:$0xff]   ;;  %v1382_v44 = vld [vmem:[#allocation5 + $0x168] sm:$0xff]   ;;  %v1385_v47 = vld [vmem:[#allocation5 + $0x120] sm:$0xff]  }
  0x59   : > { %1179 = vmatpush3.bf16.msra.mxu1 %v1349_v15  ;;  %1140 = vmatprep.subr.bf16.mxu0 %v1350_v16  ;;  %v1383_v45 = vld [vmem:[#allocation5 + $0x128] sm:$0xff]   ;;  %v1386_v48 = vld [vmem:[%s1691_s29 + $0x64] ss:$24 sps:$4 sm:$0xff]   ;;  %v1390_v50 = vld [vmem:[%s1691_s29 + $0x60] ss:$24 sps:$4 sm:$0xff]  }
  0x5a   : > { %1180 = vmatprep.subr.bf16.mxu1 %v1351_v17  ;;  %v1388_v49 = vld [vmem:[%s1691_s29 + $0x6c] ss:$24 sps:$4 sm:$0xff]   ;;  %v1392_v51 = vld [vmem:[#allocation5 + $0x158] sm:$0xff]   ;;  %v1391_v52 = vld [vmem:[%s1691_s29 + $0x68] ss:$24 sps:$4 sm:$0xff]  }
  0x5b   : > { %v1393_v53 = vld [vmem:[#allocation5 + $0x118] sm:$0xff]   ;;  %v1394_v54 = vld [vmem:[#allocation5 + $0x150] sm:$0xff]   ;;  %v1402_v58 = vld [vmem:[#allocation5 + $0x148] sm:$0xff]  }
  0x5c   : > { %1141 = vmatpush3.bf16.msra.mxu0 %v1352_v18  ;;  %v1396_v55 = vld [vmem:[%s1691_s29 + $0x94] ss:$24 sps:$4 sm:$0xff]   ;;  %v1400_v59 = vld [vmem:[%s1691_s29 + $0x90] ss:$24 sps:$4 sm:$0xff]   ;;  %v1404_v62 = vld [vmem:[#allocation5 + $0x140] sm:$0xff]  }
  0x5d   : > { %1181 = vmatpush3.bf16.msra.mxu1 %v1353_v19  ;;  %1142 = vmatprep.subr.bf16.mxu0 %v1354_v20  ;;  %v1398_v56 = vld [vmem:[%s1691_s29 + $0x9c] ss:$24 sps:$4 sm:$0xff]   ;;  %v1401_v60 = vld [vmem:[%s1691_s29 + $0x98] ss:$24 sps:$4 sm:$0xff]   ;;  %v1403_v61 = vld [vmem:[#allocation5 + $0x108] sm:$0xff]  }
  0x5e   : > { %1182 = vmatprep.subr.bf16.mxu1 %v1355_v21  ;;  %v1395_v57 = vld [vmem:[#allocation5 + $0x110] sm:$0xff]   ;;  %v1405_v1 = vld [vmem:[#allocation5 + $0x100] sm:$0xff]  }
  0x5f   : > { %v1408_v63 = vld [vmem:[%s1691_s29 + $0x14] ss:$24 sps:$4 sm:$0xff]   ;;  %v1406_v2 = vld [vmem:[%s1691_s29 + $0x10] ss:$24 sps:$4 sm:$0xff]   ;;  %v1412_v4 = vld [vmem:[%s1691_s29 + $0x44] ss:$24 sps:$4 sm:$0xff]  }
  0x60   : > { %1143 = vmatpush3.bf16.msra.mxu0 %v1356_v22  ;;  %v1411_v0 = vld [vmem:[%s1691_s29 + $0x74] ss:$24 sps:$4 sm:$0xff]   ;;  %v1409_v3 = vld [vmem:[%s1691_s29 + $0x70] ss:$24 sps:$4 sm:$0xff]   ;;  %v1414_v5 = vld [vmem:[%s1691_s29 + $0xa4] ss:$24 sps:$4 sm:$0xff]  }
  0x61   : > { %1183 = vmatpush3.bf16.msra.mxu1 %v1357_v23  ;;  %1144 = vmatprep.subr.bf16.mxu0 %v1358_v24  ;;  %v1416_v6 = vld [vmem:[%s1691_s29 + $0x40] ss:$24 sps:$4 sm:$0xff]  }
  0x62   : > { %1184 = vmatprep.subr.bf16.mxu1 %v1359_v25  ;;  %v1417_v7 = vld [vmem:[%s1691_s29 + $0xa0] ss:$24 sps:$4 sm:$0xff]  }
  0x64   : > { %1145 = vmatpush3.bf16.msra.mxu0 %v1360_v26 }
  0x65   : > { %1185 = vmatpush3.bf16.msra.mxu1 %v1361_v27  ;;  %1146 = vmatprep.subr.bf16.mxu0 %v1362_v28 }
  0x66   : > { %1186 = vmatprep.subr.bf16.mxu1 %v1363_v29 }
  0x68   : > { %1147 = vmatpush3.bf16.msra.mxu0 %v1364_v30 }
  0x69   : > { %1187 = vmatpush3.bf16.msra.mxu1 %v1365_v31  ;;  %1212 = vmatprep.subr.bf16.mxu0 %v1372_v36 }
  0x6a   : > { %1252 = vmatprep.subr.bf16.mxu1 %v1372_v36 }
  0x6b   : > { %776 = vmatmul.mubr.bf16.vlgmr.msra.gmra.mxu0 %v1366_v32 }
  0x6c   : > { %841 = vmatmul.mubr.bf16.vlgmr.msra.gmra.mxu1 %v1369_v34  ;;  %1213 = vmatpush3.bf16.msra.mxu0 %v1373_v37 }
  0x6d   : > { %1260 = vmatpush3.bf16.msra.mxu1 %v1373_v37  ;;  %1214 = vmatprep.subr.bf16.mxu0 %v1374_v38 }
  0x6e   : > { %1253 = vmatprep.subr.bf16.mxu1 %v1374_v38  ;;  %783 = vmatprep.mubr.bf16.mxu0 %v1376_v40  ;;  %v1053_v38 = vld [vmem:[%s1803_s2] ss:$0 sm:$0xff] }
  0x6f   : > { %848 = vmatprep.mubr.bf16.mxu1 %v1378_v41 }
  0x70   : > { %1215 = vmatpush3.bf16.msra.mxu0 %v1375_v39 }
  0x71   : > { %1261 = vmatpush3.bf16.msra.mxu1 %v1375_v39  ;;  %1216 = vmatprep.subr.bf16.mxu0 %v1382_v44 }
  0x72   : > { %1254 = vmatprep.subr.bf16.mxu1 %v1382_v44 }
  0x73   : > { %784 = vmatmul.mubr.bf16.gmra.mxu0 %v1380_v42 }
  0x74   : > { %849 = vmatmul.mubr.bf16.gmra.mxu1 %v1381_v43  ;;  %1217 = vmatpush3.bf16.msra.mxu0 %v1383_v45 }
  0x75   : > { %1262 = vmatpush3.bf16.msra.mxu1 %v1383_v45  ;;  %1218 = vmatprep.subr.bf16.mxu0 %v1384_v46 }
  0x76   : > { %1255 = vmatprep.subr.bf16.mxu1 %v1384_v46  ;;  %791 = vmatprep.mubr.bf16.mxu0 %v1386_v48 }
  0x77   : > { %856 = vmatprep.mubr.bf16.mxu1 %v1388_v49 }
  0x78   : > { %1219 = vmatpush3.bf16.msra.mxu0 %v1385_v47 }
  0x79   : > { %1263 = vmatpush3.bf16.msra.mxu1 %v1385_v47  ;;  %1220 = vmatprep.subr.bf16.mxu0 %v1392_v51 }
  0x7a   : > { %1256 = vmatprep.subr.bf16.mxu1 %v1392_v51 }
  0x7b   : > { %792 = vmatmul.mubr.bf16.gmra.mxu0 %v1390_v50 }
  0x7c   : > { %857 = vmatmul.mubr.bf16.gmra.mxu1 %v1391_v52  ;;  %1221 = vmatpush3.bf16.msra.mxu0 %v1393_v53 }
  0x7d   : > { %799 = vmatprep.mubr.bf16.mxu0 %v1396_v55  ;;  %1264 = vmatpush3.bf16.msra.mxu1 %v1393_v53 }
  0x7e   : > { %1222 = vmatprep.subr.bf16.mxu0 %v1394_v54  ;;  %1257 = vmatprep.subr.bf16.mxu1 %v1394_v54 }
  0x7f   : > { %864 = vmatprep.mubr.bf16.mxu1 %v1398_v56 }
  0x80   : > { %1223 = vmatpush3.bf16.msra.mxu0 %v1395_v57 }
  0x81   : > { %1265 = vmatpush3.bf16.msra.mxu1 %v1395_v57  ;;  %1224 = vmatprep.subr.bf16.mxu0 %v1402_v58 }
  0x82   : > { %1258 = vmatprep.subr.bf16.mxu1 %v1402_v58 }
  0x83   : > { %800 = vmatmul.mubr.bf16.gmra.mxu0 %v1400_v59 }
  0x84   : > { %865 = vmatmul.mubr.bf16.gmra.mxu1 %v1401_v60  ;;  %905 = vmatprep.mubr.bf16.mxu0 %v1408_v63 }
  0x85   : > { %1225 = vmatpush3.bf16.msra.mxu0 %v1403_v61  ;;  %1266 = vmatpush3.bf16.msra.mxu1 %v1403_v61 }
  0x86   : > { %1226 = vmatprep.subr.bf16.mxu0 %v1404_v62  ;;  %1259 = vmatprep.subr.bf16.mxu1 %v1404_v62 }
  0x87   : > { %921 = vmatprep.mubr.bf16.mxu1 %v1411_v0 }
  0x89   : > { %1227 = vmatpush3.bf16.msra.mxu0 %v1405_v1  ;;  %1267 = vmatpush3.bf16.msra.mxu1 %v1405_v1 }
  0x8c   : > { %906 = vmatmul.mubr.bf16.vlgmr.msra.gmra.mxu0 %v1406_v2  ;;  %922 = vmatmul.mubr.bf16.vlgmr.msra.gmra.mxu1 %v1409_v3 }
  0x8d   : > { %913 = vmatprep.mubr.bf16.mxu0 %v1412_v4  ;;  %929 = vmatprep.mubr.bf16.mxu1 %v1414_v5 }
  0x94   : > { %914 = vmatmul.mubr.bf16.gmra.mxu0 %v1416_v6  ;;  %930 = vmatmul.mubr.bf16.gmra.mxu1 %v1417_v7 }
 0x12b   : > { %v1148_v8 = vpop.f32.mrf.mxu0 }
 0x12c   : > { %v1188_v9 = vpop.f32.mrf.mxu1 }
 0x12d   : > { %v1149_v10 = vpop.f32.mrf.mxu0 }
 0x12e   : > { %v1189_v11 = vpop.f32.mrf.mxu1  ;;  %v1150_v36 = vadd.f32 %v1149_v10, %v1148_v8 }
 0x12f   : > { %v1151_v12 = vpop.f32.mrf.mxu0  ;;  %v1190_v48 = vadd.f32 %v1189_v11, %v1188_v9 }
 0x130   : > { %v1191_v13 = vpop.f32.mrf.mxu1  ;;  %v778_v43 = vadd.f32 %v1150_v36, %v1053_v38 }
 0x131   : > { %v1152_v14 = vpop.f32.mrf.mxu0 }
 0x132   : > { %v1192_v15 = vpop.f32.mrf.mxu1  ;;  %v1153_v44 = vadd.f32 %v1152_v14, %v1151_v12  ;;  %v843_v52 = vadd.f32 %v1190_v48, %v778_v43 }
 0x133   : > { %v1154_v16 = vpop.f32.mrf.mxu0  ;;  %v1193_v62 = vadd.f32 %v1192_v15, %v1191_v13 }
 0x134   : > { %v1725_v17 = vpop.f32.mrf.mxu1  ;;  %v781_v53 = vadd.f32 %v1153_v44, %v1053_v38 }
 0x135   : > { %v1155_v18 = vpop.f32.mrf.mxu0 }
 0x136   : > { %v1727_v19 = vpop.f32.mrf.mxu1  ;;  %v1156_v54 = vadd.f32 %v1155_v18, %v1154_v16  ;;  %v846_v4 = vadd.f32 %v1193_v62, %v781_v53 }
 0x137   : > { %v1157_v20 = vpop.f32.mrf.mxu0  ;;  %v1196_v14 = vadd.f32 %v1727_v19, %v1725_v17 }
 0x138   : > { %v1729_v21 = vpop.f32.mrf.mxu1  ;;  %v786_v5 = vadd.f32 %v1156_v54, %v1053_v38 }
 0x139   : > { %v1158_v22 = vpop.f32.mrf.mxu0 }
 0x13a   : > { %v1731_v23 = vpop.f32.mrf.mxu1  ;;  %v1159_v6 = vadd.f32 %v1158_v22, %v1157_v20 }
 0x13b   : > { %v1160_v24 = vpop.f32.mrf.mxu0  ;;  %v1199_v17 = vadd.f32 %v1731_v23, %v1729_v21 }
 0x13c   : > { %v1200_v25 = vpop.f32.mrf.mxu1 }
 0x13d   : > { %v1161_v26 = vpop.f32.mrf.mxu0 }
 0x13e   : > { %v1201_v27 = vpop.f32.mrf.mxu1  ;;  %v1162_v39 = vadd.f32 %v1161_v26, %v1160_v24  ;;  %v851_v24 = vadd.f32 %v1196_v14, %v786_v5 }
 0x13f   : > { %v1163_v28 = vpop.f32.mrf.mxu0  ;;  %v1202_v50 = vadd.f32 %v1201_v27, %v1200_v25  ;;  %v789_v25 = vadd.f32 %v1159_v6, %v1053_v38 }
 0x140   : > { %v1203_v29 = vpop.f32.mrf.mxu1  ;;  %v794_v45 = vadd.f32 %v1162_v39, %v1053_v38 }
 0x141   : > { %v1164_v30 = vpop.f32.mrf.mxu0  ;;  %v854_v36 = vadd.f32 %v1199_v17, %v789_v25 }
 0x142   : > { %v1204_v31 = vpop.f32.mrf.mxu1  ;;  %v1165_v46 = vadd.f32 %v1164_v30, %v1163_v28  ;;  %v859_v57 = vadd.f32 %v1202_v50, %v794_v45 }
 0x143   : > { %v1166_v32 = vpop.f32.mrf.mxu0  ;;  %v1205_v1 = vadd.f32 %v1204_v31, %v1203_v29 }
 0x144   : > { %v1206_v33 = vpop.f32.mrf.mxu1  ;;  %v797_v58 = vadd.f32 %v1165_v46, %v1053_v38 }
 0x145   : > { %v1167_v34 = vpop.f32.mrf.mxu0 }
 0x146   : > { %v1207_v35 = vpop.f32.mrf.mxu1  ;;  %v1168_v59 = vadd.f32 %v1167_v34, %v1166_v32  ;;  %v862_v9 = vadd.f32 %v1205_v1, %v797_v58 }
 0x147   : > { %v1169_v37 = vpop.f32.mrf.mxu0  ;;  %v1208_v18 = vadd.f32 %v1207_v35, %v1206_v33 }
 0x148   : > { %v1209_v40 = vpop.f32.mrf.mxu1  ;;  %v802_v10 = vadd.f32 %v1168_v59, %v1053_v38 }
 0x149   : > { %v1170_v41 = vpop.f32.mrf.mxu0 }
 0x14a   : > { %v1210_v42 = vpop.f32.mrf.mxu1  ;;  %v1171_v11 = vadd.f32 %v1170_v41, %v1169_v37  ;;  %v867_v28 = vadd.f32 %v1208_v18, %v802_v10 }
 0x14b   : > { %v1211_v33 = vadd.f32 %v1210_v42, %v1209_v40 }
 0x14c   : > { %v1228_v47 = vpop.f32.mrf.mxu0  ;;  %v1240_v49 = vpop.f32.mrf.mxu1  ;;  %v805_v29 = vadd.f32 %v1171_v11, %v1053_v38 }
 0x14e   : > { %v1229_v51 = vpop.f32.mrf.mxu0  ;;  %v1241_v56 = vpop.f32.mrf.mxu1  ;;  %v870_v39 = vadd.f32 %v1211_v33, %v805_v29 }
 0x14f   : > { %v1230_v55 = vadd.f32 %v1229_v51, %v1228_v47  ;;  %v1242_v60 = vadd.f32 %v1241_v56, %v1240_v49 }
 0x150   : > { %v1231_v61 = vpop.f32.mrf.mxu0  ;;  %v1243_v0 = vpop.f32.mrf.mxu1 }
 0x151   : > { %v908_v63 = vadd.f32 %v1230_v55, %v843_v52  ;;  %v924_v2 = vadd.f32 %v1242_v60, %v859_v57 }
 0x152   : > { %v1232_v3 = vpop.f32.mrf.mxu0  ;;  %v1244_v8 = vpop.f32.mrf.mxu1 }
 0x153   : > { %938 = vst [vmem:[%s1737_s21] sm:$0xff] %v908_v63  ;;  %v1233_v7 = vadd.f32 %v1232_v3, %v1231_v61  ;;  %942 = vst [vmem:[%s1737_s21 + $0x20] sm:$0xff] %v924_v2  ;;  %v1245_v12 = vadd.f32 %v1244_v8, %v1243_v0 }
 0x154   : > { %v1234_v13 = vpop.f32.mrf.mxu0  ;;  %v1246_v16 = vpop.f32.mrf.mxu1 }
 0x155   : > { %v911_v15 = vadd.f32 %v1233_v7, %v846_v4  ;;  %v927_v20 = vadd.f32 %v1245_v12, %v862_v9 }
 0x156   : > { %v1235_v22 = vpop.f32.mrf.mxu0  ;;  %v1247_v27 = vpop.f32.mrf.mxu1 }
 0x157   : > { %939 = vst [vmem:[%s1737_s21 + $0x8] sm:$0xff] %v911_v15  ;;  %v1236_v26 = vadd.f32 %v1235_v22, %v1234_v13  ;;  %943 = vst [vmem:[%s1737_s21 + $0x28] sm:$0xff] %v927_v20  ;;  %v1248_v30 = vadd.f32 %v1247_v27, %v1246_v16 }
 0x158   : > { %v1237_v31 = vpop.f32.mrf.mxu0  ;;  %v1249_v32 = vpop.f32.mrf.mxu1 }
 0x159   : > { %v916_v19 = vadd.f32 %v1236_v26, %v851_v24  ;;  %v932_v34 = vadd.f32 %v1248_v30, %v867_v28 }
 0x15a   : > { %v1238_v35 = vpop.f32.mrf.mxu0  ;;  %v1250_v38 = vpop.f32.mrf.mxu1 }
 0x15b   : > { %940 = vst [vmem:[%s1737_s21 + $0x10] sm:$0xff] %v916_v19  ;;  %v1239_v37 = vadd.f32 %v1238_v35, %v1237_v31  ;;  %944 = vst [vmem:[%s1737_s21 + $0x30] sm:$0xff] %v932_v34  ;;  %v1251_v21 = vadd.f32 %v1250_v38, %v1249_v32 }
 0x15d   : > { %v919_v23 = vadd.f32 %v1239_v37, %v854_v36  ;;  %v935_v40 = vadd.f32 %v1251_v21, %v870_v39 }
 0x15f   : > { %941 = vst [vmem:[%s1737_s21 + $0x18] sm:$0xff] %v919_v23  ;;  %945 = vst [vmem:[%s1737_s21 + $0x38] sm:$0xff] %v935_v40 }
 0x160   : > { %1485 = shalt.err (!%p1482_p0)
}
 0x161   : > { %s1486_s22 = scalar_lea.hbm %s1756_s7, 1024  ;;  %s1490_s29 = scalar_lea.hbm %s1804_s3, 2048 }
 0x162   : > { %p1487_p5 = scmp.ne.s32.totalorder %s1756_s7, %s1486_s22  ;;  %p1491_p4 = scmp.lt.s32.totalorder %s1756_s7, %s1804_s3 }
 0x163   : > { %p1492_p6 = scmp.lt.s32.totalorder %s1490_s29, %s1486_s22 }
 0x164   : > { %p1488_p9 = pnand %p1487_p5, %p1820_p11 }
 0x165   : > { %p1493_p8 = por %p1492_p6, %p1491_p4 }
 0x166   : > { %p1489_p1 = pneg %p1488_p9 }
 0x168   : > { %p1494_p3 = pnand %p1493_p8, %p1489_p1 }
 0x16a   : > { %1497 = shalt.err (!%p1494_p3)
}
 0x16b   : > { %s1549_s17 = smov 128   ;;  %s1550_s21 = smov 8  }
 0x16c   : > { %1277 = dma.vmem_to_hbm [thread:$0]  (%p1820_p11), %s1750_s23, 1024, %s1756_s7, %s947_s16, %s1549_s17, %s1549_s17, %s1550_s21  }
 0x16d PF: > { %s975_s25 = sand.u32 1, %s1528_s12   ;;  %p1821_p7 = scmp.ne.s32.totalorder %s1810_s19, 0 }
 0x16e   : > { %p1822_p12 = scmp.ge.s32.totalorder %s1540_s15, 2  ;;  %s976_s30 = scalar_lea.sflag [#allocation4], %s975_s25 }
 0x170   : > { %p1288_p10 = pnand %p1822_p12, %p1821_p7 }
 0x172   : > { %p1289_p2 = pneg %p1288_p10 }
 0x174   : > { %1523 = dma.done.wait (%p1289_p2), %s976_s30, 1024  }
 0x175   : > { %1525 = vsyncadd (%p1289_p2), %s976_s30, 4294966272  ;;  %p17_p13 = scmp.ge.s32.totalorder %s1625_s24, 4   ;;  %s1823_s12 = smov %s1532_s13 }
 0x176   : > { %s1824_s13 = smov %s1536_s14  ;;  %s1825_s14 = smov %s1642_s5 }
 0x177   : > { %s1826_s15 = smov %s1625_s24  ;;  %19 = sbr.rel (!%p17_p13) target bundleno = 6 (0x6), region = 81 }
 0x17c   :  { %981 = vsyncpa [#allocation3], 1 }
 0x17d   :  { %983 = vsyncpa [#allocation3 + $0x1], 1 }
 0x17e   :  { %984 = vsyncpa [#allocation6], 1 }
 0x17f   :  { %985 = vsyncpa [#allocation4], 1 }
 0x180   :  { %987 = vsyncpa [#allocation4 + $0x1], 1 }

// kernel: tpu_custom_call.1
= control target key start
LH: loop header
LB: loop body
LE: loop exit
PB: predicated region body
PF: predicated region fallthrough
CT: control target
= control target key end

     0   :  { %8 = vsyncpa [#allocation3], 0  ;;  %s1801_s0 = inlined_call_operand.hbm [shape: bf16[128,768], index: 0, kind: input, shape index: {}]   ;;  %s1802_s1 = inlined_call_operand.hbm [shape: bf16[768,128], index: 1, kind: input, shape index: {}]   ;;  %s1803_s2 = inlined_call_operand.vmem [shape: f32[1,128], index: 2, kind: input, shape index: {}]   ;;  %s1804_s3 = inlined_call_operand.hbm [shape: f32[128,128], index: 3, kind: output, shape index: {}]  }
   0x1   :  { %10 = vsyncpa [#allocation3 + $0x1], 0 }
   0x2   :  { %11 = vsyncpa [#allocation6], 0 }
   0x3   :  { %12 = vsyncpa [#allocation4], 0 }
   0x4   :  { %14 = vsyncpa [#allocation4 + $0x1], 0  ;;  %s1571_s12 = smov 0   ;;  %s1573_s13 = smov 0  }
   0x5   :  { %s1575_s14 = smov 0   ;;  %s1577_s15 = smov 0  }
   0x6 LB: > { %s1592_s16 = sadd.s32 4294967295, %s1540_s15   ;;  %s1043_s17 = sadd.s32 4294967294, %s1540_s15   ;;  %s1540_s15 = sphi %s1577_s15, %s1826_s15   ;;  %s1536_s14 = sphi %s1575_s14, %s1825_s14   ;;  %s1532_s13 = sphi %s1573_s13, %s1824_s13   ;;  %s1528_s12 = sphi %s1571_s12, %s1823_s12  }
   0x7   : > { %p40_p0 = scmp.ne.s32.totalorder %s1532_s13, %s1528_s12  ;;  %p1805_p1 = scmp.eq.s32.totalorder %s1592_s16, 0 }
   0x8   : > { %p112_p3 = scmp.eq.s32.totalorder %s1043_s17, 1  ;;  %p1044_p5 = scmp.ge.s32.totalorder %s1540_s15, 1 }
   0x9   : > { %p1601_p4 = por %p1805_p1, %p40_p0  ;;  %p119_p7 = scmp.lt.s32.totalorder %s1540_s15, 3 }
   0xa   : > { %p1606_p6 = por %p112_p3, %p40_p0  ;;  %s1542_s21 = smov [#allocation5]  }
   0xb   : > { %s1809_s18 = scalar_select %p1601_p4, 1, 0 }
   0xc   : > { %s1810_s19 = scalar_select %p1606_p6, 1, 0 }
   0xd   : > { %p1611_p8 = pnand %p1044_p5, %p119_p7  ;;  %s131_s22 = sshll.u32 %s1542_s21, 4  ;;  %s132_s22 = int_to_ptr.vmem [resolvable:$true] %s131_s22 }
   0xe   : > { %s1625_s24 = sadd.s32 1, %s1540_s15   ;;  %s27_s25 = sadd.s32 1, %s1536_s14 }
   0xf   : > { %s1811_s20 = scalar_select %p1611_p8, 1, 0 }
  0x10   : > { %p1279_p9 = pneg %p1611_p8  ;;  %s24_s26 = ssub.s32 %s1540_s15, %s1625_s24 }
  0x11   : > { %s1429_s27 = scalar_lea.vmem %s132_s22, 6144  ;;  %p1437_p5 = scmp.lt.s32.totalorder %s132_s22, %s132_s22 }
  0x12   : > { %p1620_p11 = pnand %p1279_p9, %p1805_p1  ;;  %p1430_p13 = scmp.ne.s32.totalorder %s132_s22, %s1429_s27 }
  0x13   : > { %p1438_p7 = scmp.lt.s32.totalorder %s1429_s27, %s1429_s27 }
  0x14   : > { %p1420_p12 = pneg %p1620_p11 }
  0x15   : > { %p1439_p10 = por %p1438_p7, %p1437_p5 }
  0x16   : > { %p1432_p0 = pnand %p1430_p13, %p1420_p12 }
  0x18   : > { %p1433_p3 = pneg %p1432_p0 }
  0x1a   : > { %p1440_p2 = pnand %p1439_p10, %p1433_p3 }
  0x1c   : > { %1443 = shalt.err (!%p1440_p2)
}
  0x1d   : > { %s1543_s28 = smov 64   ;;  %s1544_s29 = smov 4  }
  0x1e   : > { %1282 = dma.hbm_to_vmem [thread:$0]  (!%p1620_p11), %s1802_s1, 6144, %s132_s22, [#allocation6], %s1543_s28, %s1543_s28, %s1544_s29  }
  0x1f   : > { %p25_p9 = scmp.eq.s32.totalorder %s24_s26, 0  ;;  %p34_p12 = scmp.ne.s32.totalorder %s1536_s14, %s1532_s13 }
  0x20   : > { %p35_p10 = scmp.eq.s32.totalorder %s1540_s15, 0  ;;  %p1292_p2 = scmp.lt.s32.totalorder %s1540_s15, 2 }
  0x21   : > { %s1642_s5 = scalar_select %p25_p9, %s1536_s14, %s27_s25  }
  0x22   : > { %p36_p13 = por %p35_p10, %p34_p12  ;;  %p1813_p0 = scmp.eq.s32.totalorder %s1592_s16, 1 }
  0x23   : > { %s148_s7 = sand.u32 1, %s1536_s14   ;;  %s1269_s8 = smul.u32 3072, %s1540_s15 }
  0x24   : > { %p1646_p3 = por %p1813_p0, %p34_p12  ;;  %s1268_s9 = smul.u32 192, %s148_s7 }
  0x25   : > { %s1655_s17 = scalar_lea.hbm %s1801_s0, %s1269_s8  ;;  %p1657_p11 = pnand %p1292_p2, %p36_p13 }
  0x26   : > { %s1814_s6 = scalar_select %p1646_p3, 1, 0 }
  0x27   : > { %s152_s22 = scalar_lea.vmem [#allocation2], %s1268_s9  ;;  %s1663_s25 = scalar_lea.sflag [#allocation3], %s148_s7 }
  0x28   : > { %s160_s23 = sshll.u32 %s152_s22, 4  ;;  %s1444_s26 = scalar_lea.hbm %s1655_s17, 3072  ;;  %s1661_s23 = int_to_ptr.vmem [resolvable:$true] %s160_s23 }
  0x29   : > { %p1445_p5 = scmp.ne.s32.totalorder %s1655_s17, %s1444_s26  ;;  %p1446_p7 = pneg %p1657_p11 }
  0x2a   : > { %s1449_s29 = scalar_lea.hbm %s1801_s0, 6144  ;;  %p1450_p10 = scmp.lt.s32.totalorder %s1655_s17, %s1801_s0 }
  0x2b   : > { %p1447_p9 = pnand %p1446_p7, %p1445_p5  ;;  %p1451_p2 = scmp.lt.s32.totalorder %s1449_s29, %s1444_s26 }
  0x2d   : > { %p1448_p12 = pneg %p1447_p9  ;;  %p1452_p13 = por %p1451_p2, %p1450_p10 }
  0x2f   : > { %p1453_p0 = pnand %p1452_p13, %p1448_p12 }
  0x31   : > { %1456 = shalt.err (!%p1453_p0)
}
  0x32   : > { %s1457_s7 = scalar_lea.vmem %s1661_s23, 3072  ;;  %s1545_s8 = smov [#allocation2]  }
  0x33   : > { %p1458_p1 = scmp.ne.s32.totalorder %s1661_s23, %s1457_s7  ;;  %s1462_s9 = sshll.u32 %s1545_s8, 4  ;;  %s1463_s9 = int_to_ptr.vmem [resolvable:$false] %s1462_s9 }
  0x34   : > { %s1464_s10 = scalar_lea.vmem %s1463_s9, 6144  ;;  %p1465_p9 = scmp.lt.s32.totalorder %s1661_s23, %s1463_s9 }
  0x35   : > { %p1460_p6 = pnand %p1458_p1, %p1446_p7  ;;  %p1466_p3 = scmp.lt.s32.totalorder %s1464_s10, %s1457_s7 }
  0x37   : > { %p1461_p5 = pneg %p1460_p6  ;;  %p1467_p4 = por %p1466_p3, %p1465_p9 }
  0x39   : > { %p1468_p8 = pnand %p1467_p4, %p1461_p5 }
  0x3b   : > { %1471 = shalt.err (!%p1468_p8)
}
  0x3c   : > { %s1546_s11 = smov 384   ;;  %s1547_s22 = smov 24  }
  0x3d   : > { %1286 = dma.hbm_to_vmem [thread:$0]  (!%p1657_p11), %s1655_s17, 3072, %s1661_s23, %s1663_s25, %s1546_s11, %s1546_s11, %s1547_s22  }
  0x3e   : > { %p1816_p1 = scmp.ne.s32.totalorder %s1811_s20, 0 }
  0x3f   : > { %s1687_s26 = sand.u32 (!%p1816_p1), 1, %s1532_s13   ;;  %p1817_p4 = scmp.ne.s32.totalorder (!%p1816_p1), %s1809_s18, 0 }
  0x40   : > { %172 = sbr.rel (%p1816_p1) target bundleno = 365 (0x16d), region = 32  ;;  %s175_s28 = scalar_lea.sflag (!%p1816_p1), [#allocation3], %s1687_s26 }
  0x41   : > { %s1270_s27 = smul.u32 (!%p1816_p1), 192, %s1687_s26 }
  0x43   : > { %s1691_s29 = scalar_lea.vmem (!%p1816_p1), [#allocation2], %s1270_s27 }
  0x45   : > { %1515 = dma.done.wait (%p1817_p4), %s175_s28, 3072  }
  0x46   : > { %1517 = vsyncadd (%p1817_p4), %s175_s28, 4294964224  ;;  %p1818_p6 = scmp.eq.s32.totalorder %s1592_s16, 0 }
  0x48   : > { %1519 = dma.done.wait (%p1818_p6), [#allocation6], 6144   ;;  %p1819_p8 = pmov %p1818_p6 }
  0x49   : > { %v1334_v0 = vld [vmem:[#allocation5 + $0x78] sm:$0xff]   ;;  %v1338_v4 = vld [vmem:[#allocation5 + $0x70] sm:$0xff]   ;;  %v1342_v8 = vld [vmem:[#allocation5 + $0x68] sm:$0xff]   ;;  %s1052_s17 = sshll.u32 %s1687_s26, 6  ;;  %s1131_s25 = sshll.u32 %s1592_s16, 10 }
  0x4a   : > { %1521 = vsyncadd (%p1819_p8), [#allocation6], 4294961152  ;;  %v1335_v1 = vld [vmem:[#allocation5 + $0xf8] sm:$0xff]   ;;  %1132 = vmatprep.subr.bf16.mxu0 %v1334_v0  ;;  %v1339_v5 = vld [vmem:[#allocation5 + $0xf0] sm:$0xff]   ;;  %s1737_s21 = scalar_lea.vmem [#allocation7], %s1052_s17  ;;  %s1756_s7 = scalar_lea.hbm %s1804_s3, %s1131_s25 }
  0x4b   : > { %v1336_v2 = vld [vmem:[#allocation5 + $0x38] sm:$0xff]   ;;  %1172 = vmatprep.subr.bf16.mxu1 %v1335_v1  ;;  %v1340_v6 = vld [vmem:[#allocation5 + $0x30] sm:$0xff]   ;;  %v1343_v9 = vld [vmem:[#allocation5 + $0xe8] sm:$0xff]   ;;  %s960_s23 = sshll.u32 %s1737_s21, 4  ;;  %s947_s16 = scalar_lea.sflag [#allocation4], %s1687_s26  ;;  %s1750_s23 = int_to_ptr.vmem [resolvable:$true] %s960_s23 }
  0x4c   : > { %v1337_v3 = vld [vmem:[#allocation5 + $0xb8] sm:$0xff]   ;;  %1133 = vmatpush3.bf16.msra.mxu0 %v1336_v2  ;;  %v1341_v7 = vld [vmem:[#allocation5 + $0xb0] sm:$0xff]   ;;  %v1344_v10 = vld [vmem:[#allocation5 + $0x28] sm:$0xff]   ;;  %s1472_s8 = scalar_lea.vmem %s1750_s23, 1024  ;;  %p1820_p11 = scmp.ne.s32.totalorder %s1814_s6, 0 }
  0x4d   : > { %1173 = vmatpush3.bf16.msra.mxu1 %v1337_v3  ;;  %1134 = vmatprep.subr.bf16.mxu0 %v1338_v4  ;;  %v1345_v11 = vld [vmem:[#allocation5 + $0xa8] sm:$0xff]   ;;  %v1346_v12 = vld [vmem:[#allocation5 + $0x60] sm:$0xff]   ;;  %v1350_v16 = vld [vmem:[#allocation5 + $0x58] sm:$0xff]   ;;  %p1473_p3 = scmp.ne.s32.totalorder %s1750_s23, %s1472_s8  ;;  %s1548_s9 = smov [#allocation7]  }
  0x4e   : > { %1174 = vmatprep.subr.bf16.mxu1 %v1339_v5  ;;  %v1347_v13 = vld [vmem:[#allocation5 + $0xe0] sm:$0xff]   ;;  %v1351_v17 = vld [vmem:[#allocation5 + $0xd8] sm:$0xff]   ;;  %v1354_v20 = vld [vmem:[#allocation5 + $0x50] sm:$0xff]   ;;  %s1476_s10 = sshll.u32 %s1548_s9, 4  ;;  %s1477_s10 = int_to_ptr.vmem [resolvable:$false] %s1476_s10 }
  0x4f   : > { %v1348_v14 = vld [vmem:[#allocation5 + $0x20] sm:$0xff]   ;;  %v1352_v18 = vld [vmem:[#allocation5 + $0x18] sm:$0xff]   ;;  %v1355_v21 = vld [vmem:[#allocation5 + $0xd0] sm:$0xff]   ;;  %p1474_p7 = pnand %p1473_p3, %p1820_p11  ;;  %s1478_s11 = scalar_lea.vmem %s1477_s10, 2048 }
  0x50   : > { %1135 = vmatpush3.bf16.msra.mxu0 %v1340_v6  ;;  %v1349_v15 = vld [vmem:[#allocation5 + $0xa0] sm:$0xff]   ;;  %v1353_v19 = vld [vmem:[#allocation5 + $0x98] sm:$0xff]   ;;  %v1356_v22 = vld [vmem:[#allocation5 + $0x10] sm:$0xff]   ;;  %p1479_p10 = scmp.lt.s32.totalorder %s1750_s23, %s1477_s10  ;;  %p1480_p2 = scmp.lt.s32.totalorder %s1478_s11, %s1472_s8 }
  0x51   : > { %1175 = vmatpush3.bf16.msra.mxu1 %v1341_v7  ;;  %1136 = vmatprep.subr.bf16.mxu0 %v1342_v8  ;;  %v1357_v23 = vld [vmem:[#allocation5 + $0x90] sm:$0xff]   ;;  %v1358_v24 = vld [vmem:[#allocation5 + $0x48] sm:$0xff]   ;;  %v1362_v28 = vld [vmem:[#allocation5 + $0x40] sm:$0xff]   ;;  %p1475_p12 = pneg %p1474_p7 }
  0x52   : > { %1176 = vmatprep.subr.bf16.mxu1 %v1343_v9  ;;  %v1359_v25 = vld [vmem:[#allocation5 + $0xc8] sm:$0xff]   ;;  %v1363_v29 = vld [vmem:[#allocation5 + $0xc0] sm:$0xff]   ;;  %v1372_v36 = vld [vmem:[#allocation5 + $0x178] sm:$0xff]   ;;  %p1481_p13 = por %p1480_p2, %p1479_p10 }
  0x53   : > { %v1360_v26 = vld [vmem:[#allocation5 + $0x8] sm:$0xff]   ;;  %v1364_v30 = vld [vmem:[#allocation5] sm:$0xff]   ;;  %v1373_v37 = vld [vmem:[#allocation5 + $0x138] sm:$0xff]  }
  0x54   : > { %1137 = vmatpush3.bf16.msra.mxu0 %v1344_v10  ;;  %v1361_v27 = vld [vmem:[#allocation5 + $0x88] sm:$0xff]   ;;  %v1365_v31 = vld [vmem:[#allocation5 + $0x80] sm:$0xff]   ;;  %v1374_v38 = vld [vmem:[#allocation5 + $0x170] sm:$0xff]   ;;  %p1482_p0 = pnand %p1481_p13, %p1475_p12 }
  0x55   : > { %1177 = vmatpush3.bf16.msra.mxu1 %v1345_v11  ;;  %1138 = vmatprep.subr.bf16.mxu0 %v1346_v12  ;;  %v1366_v32 = vld [vmem:[%s1691_s29] ss:$24 sps:$4 sm:$0xff]   ;;  %v1368_v33 = vld [vmem:[%s1691_s29 + $0x4] ss:$24 sps:$4 sm:$0xff]   ;;  %v1375_v39 = vld [vmem:[#allocation5 + $0x130] sm:$0xff]  }
  0x56   : > { %1178 = vmatprep.subr.bf16.mxu1 %v1347_v13  ;;  %v1369_v34 = vld [vmem:[%s1691_s29 + $0x8] ss:$24 sps:$4 sm:$0xff]   ;;  %v1371_v35 = vld [vmem:[%s1691_s29 + $0xc] ss:$24 sps:$4 sm:$0xff]   ;;  %775 = vmatprep.mubr.bf16.mxu0 %v1368_v33  ;;  %v1378_v41 = vld [vmem:[%s1691_s29 + $0x3c] ss:$24 sps:$4 sm:$0xff]  }
  0x57   : > { %840 = vmatprep.mubr.bf16.mxu1 %v1371_v35  ;;  %v1376_v40 = vld [vmem:[%s1691_s29 + $0x34] ss:$24 sps:$4 sm:$0xff]   ;;  %v1380_v42 = vld [vmem:[%s1691_s29 + $0x30] ss:$24 sps:$4 sm:$0xff]   ;;  %v1384_v46 = vld [vmem:[#allocation5 + $0x160] sm:$0xff]  }
  0x58   : > { %1139 = vmatpush3.bf16.msra.mxu0 %v1348_v14  ;;  %v1381_v43 = vld [vmem:[%s1691_s29 + $0x38] ss:$24 sps:$4 sm:$0xff]   ;;  %v1382_v44 = vld [vmem:[#allocation5 + $0x168] sm:$0xff]   ;;  %v1385_v47 = vld [vmem:[#allocation5 + $0x120] sm:$0xff]  }
  0x59   : > { %1179 = vmatpush3.bf16.msra.mxu1 %v1349_v15  ;;  %1140 = vmatprep.subr.bf16.mxu0 %v1350_v16  ;;  %v1383_v45 = vld [vmem:[#allocation5 + $0x128] sm:$0xff]   ;;  %v1386_v48 = vld [vmem:[%s1691_s29 + $0x64] ss:$24 sps:$4 sm:$0xff]   ;;  %v1390_v50 = vld [vmem:[%s1691_s29 + $0x60] ss:$24 sps:$4 sm:$0xff]  }
  0x5a   : > { %1180 = vmatprep.subr.bf16.mxu1 %v1351_v17  ;;  %v1388_v49 = vld [vmem:[%s1691_s29 + $0x6c] ss:$24 sps:$4 sm:$0xff]   ;;  %v1392_v51 = vld [vmem:[#allocation5 + $0x158] sm:$0xff]   ;;  %v1391_v52 = vld [vmem:[%s1691_s29 + $0x68] ss:$24 sps:$4 sm:$0xff]  }
  0x5b   : > { %v1393_v53 = vld [vmem:[#allocation5 + $0x118] sm:$0xff]   ;;  %v1394_v54 = vld [vmem:[#allocation5 + $0x150] sm:$0xff]   ;;  %v1402_v58 = vld [vmem:[#allocation5 + $0x148] sm:$0xff]  }
  0x5c   : > { %1141 = vmatpush3.bf16.msra.mxu0 %v1352_v18  ;;  %v1396_v55 = vld [vmem:[%s1691_s29 + $0x94] ss:$24 sps:$4 sm:$0xff]   ;;  %v1400_v59 = vld [vmem:[%s1691_s29 + $0x90] ss:$24 sps:$4 sm:$0xff]   ;;  %v1404_v62 = vld [vmem:[#allocation5 + $0x140] sm:$0xff]  }
  0x5d   : > { %1181 = vmatpush3.bf16.msra.mxu1 %v1353_v19  ;;  %1142 = vmatprep.subr.bf16.mxu0 %v1354_v20  ;;  %v1398_v56 = vld [vmem:[%s1691_s29 + $0x9c] ss:$24 sps:$4 sm:$0xff]   ;;  %v1401_v60 = vld [vmem:[%s1691_s29 + $0x98] ss:$24 sps:$4 sm:$0xff]   ;;  %v1403_v61 = vld [vmem:[#allocation5 + $0x108] sm:$0xff]  }
  0x5e   : > { %1182 = vmatprep.subr.bf16.mxu1 %v1355_v21  ;;  %v1395_v57 = vld [vmem:[#allocation5 + $0x110] sm:$0xff]   ;;  %v1405_v1 = vld [vmem:[#allocation5 + $0x100] sm:$0xff]  }
  0x5f   : > { %v1408_v63 = vld [vmem:[%s1691_s29 + $0x14] ss:$24 sps:$4 sm:$0xff]   ;;  %v1406_v2 = vld [vmem:[%s1691_s29 + $0x10] ss:$24 sps:$4 sm:$0xff]   ;;  %v1412_v4 = vld [vmem:[%s1691_s29 + $0x44] ss:$24 sps:$4 sm:$0xff]  }
  0x60   : > { %1143 = vmatpush3.bf16.msra.mxu0 %v1356_v22  ;;  %v1411_v0 = vld [vmem:[%s1691_s29 + $0x74] ss:$24 sps:$4 sm:$0xff]   ;;  %v1409_v3 = vld [vmem:[%s1691_s29 + $0x70] ss:$24 sps:$4 sm:$0xff]   ;;  %v1414_v5 = vld [vmem:[%s1691_s29 + $0xa4] ss:$24 sps:$4 sm:$0xff]  }
  0x61   : > { %1183 = vmatpush3.bf16.msra.mxu1 %v1357_v23  ;;  %1144 = vmatprep.subr.bf16.mxu0 %v1358_v24  ;;  %v1416_v6 = vld [vmem:[%s1691_s29 + $0x40] ss:$24 sps:$4 sm:$0xff]  }
  0x62   : > { %1184 = vmatprep.subr.bf16.mxu1 %v1359_v25  ;;  %v1417_v7 = vld [vmem:[%s1691_s29 + $0xa0] ss:$24 sps:$4 sm:$0xff]  }
  0x64   : > { %1145 = vmatpush3.bf16.msra.mxu0 %v1360_v26 }
  0x65   : > { %1185 = vmatpush3.bf16.msra.mxu1 %v1361_v27  ;;  %1146 = vmatprep.subr.bf16.mxu0 %v1362_v28 }
  0x66   : > { %1186 = vmatprep.subr.bf16.mxu1 %v1363_v29 }
  0x68   : > { %1147 = vmatpush3.bf16.msra.mxu0 %v1364_v30 }
  0x69   : > { %1187 = vmatpush3.bf16.msra.mxu1 %v1365_v31  ;;  %1212 = vmatprep.subr.bf16.mxu0 %v1372_v36 }
  0x6a   : > { %1252 = vmatprep.subr.bf16.mxu1 %v1372_v36 }
  0x6b   : > { %776 = vmatmul.mubr.bf16.vlgmr.msra.gmra.mxu0 %v1366_v32 }
  0x6c   : > { %841 = vmatmul.mubr.bf16.vlgmr.msra.gmra.mxu1 %v1369_v34  ;;  %1213 = vmatpush3.bf16.msra.mxu0 %v1373_v37 }
  0x6d   : > { %1260 = vmatpush3.bf16.msra.mxu1 %v1373_v37  ;;  %1214 = vmatprep.subr.bf16.mxu0 %v1374_v38 }
  0x6e   : > { %1253 = vmatprep.subr.bf16.mxu1 %v1374_v38  ;;  %783 = vmatprep.mubr.bf16.mxu0 %v1376_v40  ;;  %v1053_v38 = vld [vmem:[%s1803_s2] ss:$0 sm:$0xff] }
  0x6f   : > { %848 = vmatprep.mubr.bf16.mxu1 %v1378_v41 }
  0x70   : > { %1215 = vmatpush3.bf16.msra.mxu0 %v1375_v39 }
  0x71   : > { %1261 = vmatpush3.bf16.msra.mxu1 %v1375_v39  ;;  %1216 = vmatprep.subr.bf16.mxu0 %v1382_v44 }
  0x72   : > { %1254 = vmatprep.subr.bf16.mxu1 %v1382_v44 }
  0x73   : > { %784 = vmatmul.mubr.bf16.gmra.mxu0 %v1380_v42 }
  0x74   : > { %849 = vmatmul.mubr.bf16.gmra.mxu1 %v1381_v43  ;;  %1217 = vmatpush3.bf16.msra.mxu0 %v1383_v45 }
  0x75   : > { %1262 = vmatpush3.bf16.msra.mxu1 %v1383_v45  ;;  %1218 = vmatprep.subr.bf16.mxu0 %v1384_v46 }
  0x76   : > { %1255 = vmatprep.subr.bf16.mxu1 %v1384_v46  ;;  %791 = vmatprep.mubr.bf16.mxu0 %v1386_v48 }
  0x77   : > { %856 = vmatprep.mubr.bf16.mxu1 %v1388_v49 }
  0x78   : > { %1219 = vmatpush3.bf16.msra.mxu0 %v1385_v47 }
  0x79   : > { %1263 = vmatpush3.bf16.msra.mxu1 %v1385_v47  ;;  %1220 = vmatprep.subr.bf16.mxu0 %v1392_v51 }
  0x7a   : > { %1256 = vmatprep.subr.bf16.mxu1 %v1392_v51 }
  0x7b   : > { %792 = vmatmul.mubr.bf16.gmra.mxu0 %v1390_v50 }
  0x7c   : > { %857 = vmatmul.mubr.bf16.gmra.mxu1 %v1391_v52  ;;  %1221 = vmatpush3.bf16.msra.mxu0 %v1393_v53 }
  0x7d   : > { %799 = vmatprep.mubr.bf16.mxu0 %v1396_v55  ;;  %1264 = vmatpush3.bf16.msra.mxu1 %v1393_v53 }
  0x7e   : > { %1222 = vmatprep.subr.bf16.mxu0 %v1394_v54  ;;  %1257 = vmatprep.subr.bf16.mxu1 %v1394_v54 }
  0x7f   : > { %864 = vmatprep.mubr.bf16.mxu1 %v1398_v56 }
  0x80   : > { %1223 = vmatpush3.bf16.msra.mxu0 %v1395_v57 }
  0x81   : > { %1265 = vmatpush3.bf16.msra.mxu1 %v1395_v57  ;;  %1224 = vmatprep.subr.bf16.mxu0 %v1402_v58 }
  0x82   : > { %1258 = vmatprep.subr.bf16.mxu1 %v1402_v58 }
  0x83   : > { %800 = vmatmul.mubr.bf16.gmra.mxu0 %v1400_v59 }
  0x84   : > { %865 = vmatmul.mubr.bf16.gmra.mxu1 %v1401_v60  ;;  %905 = vmatprep.mubr.bf16.mxu0 %v1408_v63 }
  0x85   : > { %1225 = vmatpush3.bf16.msra.mxu0 %v1403_v61  ;;  %1266 = vmatpush3.bf16.msra.mxu1 %v1403_v61 }
  0x86   : > { %1226 = vmatprep.subr.bf16.mxu0 %v1404_v62  ;;  %1259 = vmatprep.subr.bf16.mxu1 %v1404_v62 }
  0x87   : > { %921 = vmatprep.mubr.bf16.mxu1 %v1411_v0 }
  0x89   : > { %1227 = vmatpush3.bf16.msra.mxu0 %v1405_v1  ;;  %1267 = vmatpush3.bf16.msra.mxu1 %v1405_v1 }
  0x8c   : > { %906 = vmatmul.mubr.bf16.vlgmr.msra.gmra.mxu0 %v1406_v2  ;;  %922 = vmatmul.mubr.bf16.vlgmr.msra.gmra.mxu1 %v1409_v3 }
  0x8d   : > { %913 = vmatprep.mubr.bf16.mxu0 %v1412_v4  ;;  %929 = vmatprep.mubr.bf16.mxu1 %v1414_v5 }
  0x94   : > { %914 = vmatmul.mubr.bf16.gmra.mxu0 %v1416_v6  ;;  %930 = vmatmul.mubr.bf16.gmra.mxu1 %v1417_v7 }
 0x12b   : > { %v1148_v8 = vpop.f32.mrf.mxu0 }
 0x12c   : > { %v1188_v9 = vpop.f32.mrf.mxu1 }
 0x12d   : > { %v1149_v10 = vpop.f32.mrf.mxu0 }
 0x12e   : > { %v1189_v11 = vpop.f32.mrf.mxu1  ;;  %v1150_v36 = vadd.f32 %v1149_v10, %v1148_v8 }
 0x12f   : > { %v1151_v12 = vpop.f32.mrf.mxu0  ;;  %v1190_v48 = vadd.f32 %v1189_v11, %v1188_v9 }
 0x130   : > { %v1191_v13 = vpop.f32.mrf.mxu1  ;;  %v778_v43 = vadd.f32 %v1150_v36, %v1053_v38 }
 0x131   : > { %v1152_v14 = vpop.f32.mrf.mxu0 }
 0x132   : > { %v1192_v15 = vpop.f32.mrf.mxu1  ;;  %v1153_v44 = vadd.f32 %v1152_v14, %v1151_v12  ;;  %v843_v52 = vadd.f32 %v1190_v48, %v778_v43 }
 0x133   : > { %v1154_v16 = vpop.f32.mrf.mxu0  ;;  %v1193_v62 = vadd.f32 %v1192_v15, %v1191_v13 }
 0x134   : > { %v1725_v17 = vpop.f32.mrf.mxu1  ;;  %v781_v53 = vadd.f32 %v1153_v44, %v1053_v38 }
 0x135   : > { %v1155_v18 = vpop.f32.mrf.mxu0 }
 0x136   : > { %v1727_v19 = vpop.f32.mrf.mxu1  ;;  %v1156_v54 = vadd.f32 %v1155_v18, %v1154_v16  ;;  %v846_v4 = vadd.f32 %v1193_v62, %v781_v53 }
 0x137   : > { %v1157_v20 = vpop.f32.mrf.mxu0  ;;  %v1196_v14 = vadd.f32 %v1727_v19, %v1725_v17 }
 0x138   : > { %v1729_v21 = vpop.f32.mrf.mxu1  ;;  %v786_v5 = vadd.f32 %v1156_v54, %v1053_v38 }
 0x139   : > { %v1158_v22 = vpop.f32.mrf.mxu0 }
 0x13a   : > { %v1731_v23 = vpop.f32.mrf.mxu1  ;;  %v1159_v6 = vadd.f32 %v1158_v22, %v1157_v20 }
 0x13b   : > { %v1160_v24 = vpop.f32.mrf.mxu0  ;;  %v1199_v17 = vadd.f32 %v1731_v23, %v1729_v21 }
 0x13c   : > { %v1200_v25 = vpop.f32.mrf.mxu1 }
 0x13d   : > { %v1161_v26 = vpop.f32.mrf.mxu0 }
 0x13e   : > { %v1201_v27 = vpop.f32.mrf.mxu1  ;;  %v1162_v39 = vadd.f32 %v1161_v26, %v1160_v24  ;;  %v851_v24 = vadd.f32 %v1196_v14, %v786_v5 }
 0x13f   : > { %v1163_v28 = vpop.f32.mrf.mxu0  ;;  %v1202_v50 = vadd.f32 %v1201_v27, %v1200_v25  ;;  %v789_v25 = vadd.f32 %v1159_v6, %v1053_v38 }
 0x140   : > { %v1203_v29 = vpop.f32.mrf.mxu1  ;;  %v794_v45 = vadd.f32 %v1162_v39, %v1053_v38 }
 0x141   : > { %v1164_v30 = vpop.f32.mrf.mxu0  ;;  %v854_v36 = vadd.f32 %v1199_v17, %v789_v25 }
 0x142   : > { %v1204_v31 = vpop.f32.mrf.mxu1  ;;  %v1165_v46 = vadd.f32 %v1164_v30, %v1163_v28  ;;  %v859_v57 = vadd.f32 %v1202_v50, %v794_v45 }
 0x143   : > { %v1166_v32 = vpop.f32.mrf.mxu0  ;;  %v1205_v1 = vadd.f32 %v1204_v31, %v1203_v29 }
 0x144   : > { %v1206_v33 = vpop.f32.mrf.mxu1  ;;  %v797_v58 = vadd.f32 %v1165_v46, %v1053_v38 }
 0x145   : > { %v1167_v34 = vpop.f32.mrf.mxu0 }
 0x146   : > { %v1207_v35 = vpop.f32.mrf.mxu1  ;;  %v1168_v59 = vadd.f32 %v1167_v34, %v1166_v32  ;;  %v862_v9 = vadd.f32 %v1205_v1, %v797_v58 }
 0x147   : > { %v1169_v37 = vpop.f32.mrf.mxu0  ;;  %v1208_v18 = vadd.f32 %v1207_v35, %v1206_v33 }
 0x148   : > { %v1209_v40 = vpop.f32.mrf.mxu1  ;;  %v802_v10 = vadd.f32 %v1168_v59, %v1053_v38 }
 0x149   : > { %v1170_v41 = vpop.f32.mrf.mxu0 }
 0x14a   : > { %v1210_v42 = vpop.f32.mrf.mxu1  ;;  %v1171_v11 = vadd.f32 %v1170_v41, %v1169_v37  ;;  %v867_v28 = vadd.f32 %v1208_v18, %v802_v10 }
 0x14b   : > { %v1211_v33 = vadd.f32 %v1210_v42, %v1209_v40 }
 0x14c   : > { %v1228_v47 = vpop.f32.mrf.mxu0  ;;  %v1240_v49 = vpop.f32.mrf.mxu1  ;;  %v805_v29 = vadd.f32 %v1171_v11, %v1053_v38 }
 0x14e   : > { %v1229_v51 = vpop.f32.mrf.mxu0  ;;  %v1241_v56 = vpop.f32.mrf.mxu1  ;;  %v870_v39 = vadd.f32 %v1211_v33, %v805_v29 }
 0x14f   : > { %v1230_v55 = vadd.f32 %v1229_v51, %v1228_v47  ;;  %v1242_v60 = vadd.f32 %v1241_v56, %v1240_v49 }
 0x150   : > { %v1231_v61 = vpop.f32.mrf.mxu0  ;;  %v1243_v0 = vpop.f32.mrf.mxu1 }
 0x151   : > { %v908_v63 = vadd.f32 %v1230_v55, %v843_v52  ;;  %v924_v2 = vadd.f32 %v1242_v60, %v859_v57 }
 0x152   : > { %v1232_v3 = vpop.f32.mrf.mxu0  ;;  %v1244_v8 = vpop.f32.mrf.mxu1 }
 0x153   : > { %938 = vst [vmem:[%s1737_s21] sm:$0xff] %v908_v63  ;;  %v1233_v7 = vadd.f32 %v1232_v3, %v1231_v61  ;;  %942 = vst [vmem:[%s1737_s21 + $0x20] sm:$0xff] %v924_v2  ;;  %v1245_v12 = vadd.f32 %v1244_v8, %v1243_v0 }
 0x154   : > { %v1234_v13 = vpop.f32.mrf.mxu0  ;;  %v1246_v16 = vpop.f32.mrf.mxu1 }
 0x155   : > { %v911_v15 = vadd.f32 %v1233_v7, %v846_v4  ;;  %v927_v20 = vadd.f32 %v1245_v12, %v862_v9 }
 0x156   : > { %v1235_v22 = vpop.f32.mrf.mxu0  ;;  %v1247_v27 = vpop.f32.mrf.mxu1 }
 0x157   : > { %939 = vst [vmem:[%s1737_s21 + $0x8] sm:$0xff] %v911_v15  ;;  %v1236_v26 = vadd.f32 %v1235_v22, %v1234_v13  ;;  %943 = vst [vmem:[%s1737_s21 + $0x28] sm:$0xff] %v927_v20  ;;  %v1248_v30 = vadd.f32 %v1247_v27, %v1246_v16 }
 0x158   : > { %v1237_v31 = vpop.f32.mrf.mxu0  ;;  %v1249_v32 = vpop.f32.mrf.mxu1 }
 0x159   : > { %v916_v19 = vadd.f32 %v1236_v26, %v851_v24  ;;  %v932_v34 = vadd.f32 %v1248_v30, %v867_v28 }
 0x15a   : > { %v1238_v35 = vpop.f32.mrf.mxu0  ;;  %v1250_v38 = vpop.f32.mrf.mxu1 }
 0x15b   : > { %940 = vst [vmem:[%s1737_s21 + $0x10] sm:$0xff] %v916_v19  ;;  %v1239_v37 = vadd.f32 %v1238_v35, %v1237_v31  ;;  %944 = vst [vmem:[%s1737_s21 + $0x30] sm:$0xff] %v932_v34  ;;  %v1251_v21 = vadd.f32 %v1250_v38, %v1249_v32 }
 0x15d   : > { %v919_v23 = vadd.f32 %v1239_v37, %v854_v36  ;;  %v935_v40 = vadd.f32 %v1251_v21, %v870_v39 }
 0x15f   : > { %941 = vst [vmem:[%s1737_s21 + $0x18] sm:$0xff] %v919_v23  ;;  %945 = vst [vmem:[%s1737_s21 + $0x38] sm:$0xff] %v935_v40 }
 0x160   : > { %1485 = shalt.err (!%p1482_p0)
}
 0x161   : > { %s1486_s22 = scalar_lea.hbm %s1756_s7, 1024  ;;  %s1490_s29 = scalar_lea.hbm %s1804_s3, 2048 }
 0x162   : > { %p1487_p5 = scmp.ne.s32.totalorder %s1756_s7, %s1486_s22  ;;  %p1491_p4 = scmp.lt.s32.totalorder %s1756_s7, %s1804_s3 }
 0x163   : > { %p1492_p6 = scmp.lt.s32.totalorder %s1490_s29, %s1486_s22 }
 0x164   : > { %p1488_p9 = pnand %p1487_p5, %p1820_p11 }
 0x165   : > { %p1493_p8 = por %p1492_p6, %p1491_p4 }
 0x166   : > { %p1489_p1 = pneg %p1488_p9 }
 0x168   : > { %p1494_p3 = pnand %p1493_p8, %p1489_p1 }
 0x16a   : > { %1497 = shalt.err (!%p1494_p3)
}
 0x16b   : > { %s1549_s17 = smov 128   ;;  %s1550_s21 = smov 8  }
 0x16c   : > { %1277 = dma.vmem_to_hbm [thread:$0]  (%p1820_p11), %s1750_s23, 1024, %s1756_s7, %s947_s16, %s1549_s17, %s1549_s17, %s1550_s21  }
 0x16d PF: > { %s975_s25 = sand.u32 1, %s1528_s12   ;;  %p1821_p7 = scmp.ne.s32.totalorder %s1810_s19, 0 }
 0x16e   : > { %p1822_p12 = scmp.ge.s32.totalorder %s1540_s15, 2  ;;  %s976_s30 = scalar_lea.sflag [#allocation4], %s975_s25 }
 0x170   : > { %p1288_p10 = pnand %p1822_p12, %p1821_p7 }
 0x172   : > { %p1289_p2 = pneg %p1288_p10 }
 0x174   : > { %1523 = dma.done.wait (%p1289_p2), %s976_s30, 1024  }
 0x175   : > { %1525 = vsyncadd (%p1289_p2), %s976_s30, 4294966272  ;;  %p17_p13 = scmp.ge.s32.totalorder %s1625_s24, 4   ;;  %s1823_s12 = smov %s1532_s13 }
 0x176   : > { %s1824_s13 = smov %s1536_s14  ;;  %s1825_s14 = smov %s1642_s5 }
 0x177   : > { %s1826_s15 = smov %s1625_s24  ;;  %19 = sbr.rel (!%p17_p13) target bundleno = 6 (0x6), region = 81 }
 0x17c   :  { %981 = vsyncpa [#allocation3], 1 }
 0x17d   :  { %983 = vsyncpa [#allocation3 + $0x1], 1 }
 0x17e   :  { %984 = vsyncpa [#allocation6], 1 }
 0x17f   :  { %985 = vsyncpa [#allocation4], 1 }
 0x180   :  { %987 = vsyncpa [#allocation4 + $0x1], 1 }

</bundles_post_ra>
